<compile_context>
chip_gen: v7x
topology: tpu7x:2x2x1
jax: 0.10.0
libtpu: 0.0.40
codegen_flags: <defaults>
</compile_context>

<pallas_src>
import jax
import jax.numpy as jnp
from jax import lax
from jax.experimental import pallas as pl
from jax.experimental.pallas import tpu as pltpu

EPS = 1e-12                      # torch.nn.functional.normalize default eps
_VMEM_LIMIT = 32 * 1024 * 1024   # safe on v5e/v6e/v7x; tiles sized well below


def _pick_base_tile(b):
    """Lane/MXU-friendly base-bank row tile; full-extent block for tiny banks."""
    if b >= 1024:
        return 1024
    if b >= 128:
        return (b // 128) * 128   # multiple of 128, <= b
    return b                      # full extent -> always a legal block shape


# ---------------------------------------------------------------------------
# Kernel 1: support prototype = norm(mean(norm(support_raw), axis=1))   -> (E, D)
# (support slice is tiny in few-shot settings: single block)
# ---------------------------------------------------------------------------
def _proto_kernel(s_ref, o_ref):
    s = s_ref[...].astype(jnp.float32)                                  # (E, S, D)
    inv_s = lax.rsqrt(jnp.maximum(jnp.sum(s * s, -1, keepdims=True), EPS * EPS))
    m = jnp.mean(s * inv_s, axis=1)                                     # (E, D)
    inv_m = lax.rsqrt(jnp.maximum(jnp.sum(m * m, -1, keepdims=True), EPS * EPS))
    o_ref[...] = (m * inv_m).astype(o_ref.dtype)


def support_prototype(support_raw):
    E, S, D = support_raw.shape
    return pl.pallas_call(
        _proto_kernel,
        out_shape=jax.ShapeDtypeStruct((E, D), jnp.float32),
        grid=(1,),
        in_specs=[pl.BlockSpec((E, S, D), lambda i: (0, 0, 0))],
        out_specs=pl.BlockSpec((E, D), lambda i: (0, 0)),
        compiler_params=pltpu.CompilerParams(vmem_limit_bytes=_VMEM_LIMIT),
    )(support_raw)


# ---------------------------------------------------------------------------
# Kernel 2: cosine similarity vs the RAW base bank, tiled over B
#   base-row normalization fused in:  similar[:, tile] = proto @ norm(base_tile).T
#   (last partial tile: out-of-bounds columns are simply dropped on write)
# ---------------------------------------------------------------------------
def _sim_kernel(p_ref, b_ref, o_ref):
    p = p_ref[...].astype(jnp.float32)                                  # (E, D)
    b = b_ref[...].astype(jnp.float32)                                  # (TB, D)
    inv = lax.rsqrt(jnp.maximum(jnp.sum(b * b, -1, keepdims=True), EPS * EPS))
    o_ref[...] = lax.dot_general(p, b * inv, (((1,), (1,)), ((), ())),
                                 precision=lax.Precision.HIGHEST,
                                 preferred_element_type=jnp.float32)


def support_similarity(proto, base_raw, tb):
    E, D = proto.shape
    B = base_raw.shape[0]
    return pl.pallas_call(
        _sim_kernel,
        out_shape=jax.ShapeDtypeStruct((E, B), jnp.float32),
        grid=(pl.cdiv(B, tb),),
        in_specs=[pl.BlockSpec((E, D), lambda j: (0, 0)),
                  pl.BlockSpec((tb, D), lambda j: (j, 0))],
        out_specs=pl.BlockSpec((E, tb), lambda j: (0, j)),
        compiler_params=pltpu.CompilerParams(
            dimension_semantics=("parallel",), vmem_limit_bytes=_VMEM_LIMIT),
    )(proto, base_raw)


# ---------------------------------------------------------------------------
# Kernel 3: top-k weighted base approximation as a dense masked MXU matmul
#   w = sqrt(sim) * (sim >= kth);  approx ∝ sum_b w_b * norm(base_b)
#   (division by sum(w) cancels with the final L2 normalization -> skipped)
# Grid = (2 "parallel" halves of the bank, tiles-per-half "arbitrary" reduction)
# so v7x's two TensorCores each stream half the bank; the tiny combine is a
# JAX epilogue.  Base normalization fused; ragged tiles masked by row index.
# ---------------------------------------------------------------------------
def _make_wsum_kernel(tb, n_base, half_tiles):
    def _wsum_kernel(sim_ref, kth_ref, base_ref, o_ref, acc_ref):
        h = pl.program_id(0)
        j = pl.program_id(1)

        @pl.when(j == 0)
        def _():
            acc_ref[...] = jnp.zeros_like(acc_ref)

        start = (h * half_tiles + j) * tb        # unclamped global base-row offset
        sim = sim_ref[...].astype(jnp.float32)   # (E, TB) - exact stored sim values
        kth = kth_ref[...][:, :1]                # (E, 1) from lane-dense (E, 128)
        col = lax.broadcasted_iota(jnp.int32, sim.shape, 1) + start
        sel = jnp.logical_and(col < n_base, sim >= kth)
        # sqrt matches torch.pow(sim_cos, 0.5): a selected negative similarity gives
        # NaN that poisons that episode's approximation, exactly as in torch.
        w = jnp.where(sel, jnp.sqrt(sim), 0.0)

        b = base_ref[...].astype(jnp.float32)    # (TB, D) raw base rows
        row = lax.broadcasted_iota(jnp.int32, (b.shape[0], 1), 0) + start
        b = jnp.where(row < n_base, b, 0.0)      # kill out-of-bounds garbage rows
        inv = lax.rsqrt(jnp.maximum(jnp.sum(b * b, -1, keepdims=True), EPS * EPS))

        acc_ref[...] += lax.dot_general(w, b * inv, (((1,), (0,)), ((), ())),
                                        precision=lax.Precision.HIGHEST,
                                        preferred_element_type=jnp.float32)

        @pl.when(j == pl.num_programs(1) - 1)
        def _():
            o_ref[...] = acc_ref[...]
    return _wsum_kernel


def weighted_base_sum(similar, kth, base_raw, tb):
    E, B = similar.shape
    D = base_raw.shape[1]
    tiles = pl.cdiv(B, tb)
    half_tiles = pl.cdiv(tiles, 2)
    clamp = lambda t: jnp.minimum(t, tiles - 1)   # phantom tile (odd #tiles) is re-read
    kth128 = jnp.broadcast_to(kth, (E, 128))      # lane-dense threshold block
    parts = pl.pallas_call(
        _make_wsum_kernel(tb, B, half_tiles),
        out_shape=jax.ShapeDtypeStruct((2, E, D), jnp.float32),
        grid=(2, half_tiles),
        in_specs=[pl.BlockSpec((E, tb), lambda h, j: (0, clamp(h * half_tiles + j))),
                  pl.BlockSpec((E, 128), lambda h, j: (0, 0)),
                  pl.BlockSpec((tb, D), lambda h, j: (clamp(h * half_tiles + j), 0))],
        out_specs=pl.BlockSpec((None, E, D), lambda h, j: (h, 0, 0)),
        scratch_shapes=[pltpu.VMEM((E, D), jnp.float32)],
        compiler_params=pltpu.CompilerParams(
            dimension_semantics=("parallel", "arbitrary"),
            vmem_limit_bytes=_VMEM_LIMIT),
    )(similar, kth128, base_raw)
    # Tiny (2, E, D) combine + final L2 normalization in plain JAX.
    a = parts[0] + parts[1]
    inv = lax.rsqrt(jnp.maximum(jnp.sum(a * a, -1, keepdims=True), EPS * EPS))
    return a * inv                                                      # (E, D)


# ---------------------------------------------------------------------------
# Kernel 4: projection removal + renorm on RAW features (no pre-normalization):
#   norm(norm(f) - <norm(f),a> a) == norm(f - <f,a> a)   (a is unit-norm)
#   (sin_val of get_cos_sin is unused by forward -> skipped)
# ---------------------------------------------------------------------------
def _project_kernel(f_ref, a_ref, o_ref):
    f = f_ref[...].astype(jnp.float32)                                  # (TN, D)
    a = a_ref[...].astype(jnp.float32)                                  # (1, D)
    cos = jnp.sum(f * a, -1, keepdims=True)
    r = f - cos * a
    inv = lax.rsqrt(jnp.maximum(jnp.sum(r * r, -1, keepdims=True), EPS * EPS))
    o_ref[...] = (r * inv).astype(o_ref.dtype)


def norm_and_project(features, approx, row_tile=512):
    E, N, D = features.shape
    tn = row_tile if N >= row_tile else N          # full extent when N is small
    approx3 = approx[:, None, :]                   # (E, 1, D)
    return pl.pallas_call(
        _project_kernel,
        out_shape=jax.ShapeDtypeStruct((E, N, D), features.dtype),
        grid=(E, pl.cdiv(N, tn)),
        in_specs=[pl.BlockSpec((None, tn, D), lambda e, n: (e, n, 0)),
                  pl.BlockSpec((None, 1, D), lambda e, n: (e, 0, 0))],
        out_specs=pl.BlockSpec((None, tn, D), lambda e, n: (e, n, 0)),
        compiler_params=pltpu.CompilerParams(
            dimension_semantics=("parallel", "parallel"),
            vmem_limit_bytes=_VMEM_LIMIT),
    )(features, approx3)


# ---------------------------------------------------------------------------
# TCPR.forward
# ---------------------------------------------------------------------------
def tcpr_forward(features, base_features, support_labels, k=15000):
    E, N, D = features.shape
    B = base_features.shape[0]
    S = support_labels.shape[1]

    # Support prototype norm(mean(norm(support))) from the (tiny) raw support slice.
    proto = support_prototype(features[:, :S])                          # (E, D)

    tb = _pick_base_tile(B)

    # Cosine similarity against the raw base bank (normalization fused in-kernel).
    similar = support_similarity(proto, base_features, tb)              # (E, B)

    k_eff = int(0.1 * B) if B < k else k                 # module's k fallback
    k_eff = max(k_eff, 1)                                # guard degenerate tiny banks
    # TODO(synk): top-k itself stays in plain JAX; only the k-th similarity value is
    # needed (as a dense threshold), so the (E, k, D) gather is never materialized.
    kth = lax.top_k(similar, k_eff)[0][:, -1:]                          # (E, 1)
    # Note: exact ties at the k-th value include the tied extras (vs torch.topk).

    approx = weighted_base_sum(similar, kth, base_features, tb)         # (E, D)

    return norm_and_project(features, approx)                           # (E, N, D)


# ---------------------------------------------------------------------------
# Pure-JAX reference (mirrors the PyTorch module) for validation.
# ---------------------------------------------------------------------------
def _tcpr_reference(features, base_features, support_labels, k=15000):
    def _norm(x):
        n = jnp.sqrt(jnp.sum(x * x, axis=-1, keepdims=True))
        return x / jnp.maximum(n, EPS)

    features = _norm(features)
    s = support_labels.shape[1]
    support = features[:, :s]
    base_n = _norm(base_features)                                       # (B, D)
    proto = _norm(jnp.mean(support, axis=1))                            # (E, D)
    n_base = base_features.shape[0]
    k_eff = int(0.1 * n_base) if n_base < k else k
    k_eff = max(k_eff, 1)
    similar = jnp.matmul(proto, base_n.T, precision=lax.Precision.HIGHEST)
    sim_cos, pred = lax.top_k(similar, k_eff)
    w = jnp.sqrt(sim_cos)
    w = w / jnp.sum(w, axis=1, keepdims=True)
    approx = _norm(jnp.sum(w[:, :, None] * base_n[pred], axis=1))[:, None, :]
    cos = (jnp.sum(features * approx, -1, keepdims=True)
           / jnp.sqrt(jnp.sum(features * features, -1, keepdims=True))
           / jnp.sqrt(jnp.sum(approx * approx, -1, keepdims=True)))
    return _norm(features - cos * approx)


if __name__ == "__main__":
    key = jax.random.PRNGKey(0)
    k1, k2 = jax.random.split(key, 2)

    E, N, D = 2, 16, 128    # episodes, samples per episode, feature dim
    S = 4                   # support samples (support_labels.shape[1])
    B = 200                 # base bank rows (< k=15000 -> k_eff = 20); ragged base tile

    features = jax.random.normal(k1, (E, N, D), dtype=jnp.float32)
    base_features = jax.random.normal(k2, (B, D), dtype=jnp.float32)
    support_labels = jnp.zeros((E, S), dtype=jnp.int32)

    out = jax.block_until_ready(tcpr_forward(features, base_features, support_labels))
    assert out.shape == (E, N, D)
    assert bool(jnp.all(jnp.isfinite(out)))

    ref = _tcpr_reference(features, base_features, support_labels)
    err = float(jnp.max(jnp.abs(out - ref)))
    assert err < 1e-3, err
    print("KERNEL_OK")
</pallas_src>

<mosaic_0001>
module attributes {stable_mosaic.version = 11 : i64} {
  func.func @_proto_kernel(%arg0: i32, %arg1: memref<2x4x128xf32, #tpu.memory_space<vmem>>, %arg2: memref<2x128xf32, #tpu.memory_space<vmem>>) attributes {dimension_semantics = [#tpu.dimension_semantics<arbitrary>], iteration_bounds = array<i64: 1>, scalar_prefetch = 0 : i64, scratch_operands = 0 : i64, tpu.core_type = #tpu.core_type<tc>, window_params = [{pipeline_mode = #tpu.pipeline_mode<synchronous>, transform_indices = @transform_0, window_bounds = array<i64: 2, 4, 128>}, {pipeline_mode = #tpu.pipeline_mode<synchronous>, transform_indices = @transform_1, window_bounds = array<i64: 2, 128>}]} {
    %c0 = arith.constant 0 : index
    %c0_0 = arith.constant 0 : index
    %c0_1 = arith.constant 0 : index
    %0 = vector.load %arg1[%c0, %c0_0, %c0_1] : memref<2x4x128xf32, #tpu.memory_space<vmem>>, vector<2x4x128xf32>
    %1 = arith.mulf %0, %0 : vector<2x4x128xf32>
    %cst = arith.constant dense<0.000000e+00> : vector<2x4xf32>
    %2 = vector.multi_reduction <add>, %1, %cst [2] : vector<2x4x128xf32> to vector<2x4xf32>
    %3 = vector.shape_cast %2 : vector<2x4xf32> to vector<2x4x1xf32>
    %cst_2 = arith.constant 1.000000e-24 : f32
    %4 = vector.broadcast %cst_2 : f32 to vector<2x4x1xf32>
    %5 = arith.maximumf %3, %4 : vector<2x4x1xf32>
    %6 = math.rsqrt %5 : vector<2x4x1xf32>
    %7 = vector.broadcast %6 : vector<2x4x1xf32> to vector<2x4x128xf32>
    %8 = arith.mulf %0, %7 : vector<2x4x128xf32>
    %cst_3 = arith.constant dense<0.000000e+00> : vector<2x128xf32>
    %9 = vector.multi_reduction <add>, %8, %cst_3 [1] : vector<2x4x128xf32> to vector<2x128xf32>
    %cst_4 = arith.constant 4.000000e+00 : f32
    %10 = vector.broadcast %cst_4 : f32 to vector<2x128xf32>
    %11 = arith.divf %9, %10 : vector<2x128xf32>
    %12 = arith.mulf %11, %11 : vector<2x128xf32>
    %cst_5 = arith.constant dense<0.000000e+00> : vector<2xf32>
    %13 = vector.multi_reduction <add>, %12, %cst_5 [1] : vector<2x128xf32> to vector<2xf32>
    %14 = vector.shape_cast %13 : vector<2xf32> to vector<2x1xf32>
    %cst_6 = arith.constant 1.000000e-24 : f32
    %15 = vector.broadcast %cst_6 : f32 to vector<2x1xf32>
    %16 = arith.maximumf %14, %15 : vector<2x1xf32>
    %17 = math.rsqrt %16 : vector<2x1xf32>
    %18 = vector.broadcast %17 : vector<2x1xf32> to vector<2x128xf32>
    %19 = arith.mulf %11, %18 : vector<2x128xf32>
    %c0_7 = arith.constant 0 : index
    %c0_8 = arith.constant 0 : index
    %20 = vector.load %arg2[%c0_7, %c0_8] : memref<2x128xf32, #tpu.memory_space<vmem>>, vector<2x128xf32>
    tpu.vector_store %arg2[%c0_7, %c0_8], %19 {strides = array<i32>} : memref<2x128xf32, #tpu.memory_space<vmem>>, vector<2x128xf32>,
    return
  }
  func.func @transform_0(%arg0: i32) -> (i32, i32, i32) {
    %c0_i32 = arith.constant 0 : i32
    %c0_i32_0 = arith.constant 0 : i32
    %c0_i32_1 = arith.constant 0 : i32
    %c0_i32_2 = arith.constant 0 : i32
    return %c0_i32, %c0_i32_0, %c0_i32_1 : i32, i32, i32
  }
  func.func @transform_1(%arg0: i32) -> (i32, i32) {
    %c0_i32 = arith.constant 0 : i32
    %c0_i32_0 = arith.constant 0 : i32
    %c0_i32_1 = arith.constant 0 : i32
    return %c0_i32, %c0_i32_0 : i32, i32
  }
}

</mosaic_0001>

<bundles_post_ra>
// kernel: tpu_custom_call.1
= control target key start
LH: loop header
LB: loop body
LE: loop exit
PB: predicated region body
PF: predicated region fallthrough
CT: control target
= control target key end

     0   :  { %6 = vsyncpa [#allocation3], 0  ;;  %s199_s0 = inlined_call_operand.hbm [shape: f32[2,4,128], index: 0, kind: input, shape index: {}]   ;;  %s200_s1 = inlined_call_operand.hbm [shape: f32[2,128], index: 1, kind: output, shape index: {}]  }
   0x1   :  { %7 = vsyncpa [#allocation4], 0  ;;  %s155_s6 = smov [#allocation2]   ;;  %s107_s10 = scalar_lea.hbm %s199_s0, 128 }
   0x2   :  { %s13_s7 = sshll.u32 %s155_s6, 4  ;;  %p108_p0 = scmp.ne.s32.totalorder %s199_s0, %s107_s10  ;;  %s14_s7 = int_to_ptr.vmem [resolvable:$true] %s13_s7 }
   0x3   :  { %p111_p1 = scmp.lt.u32.totalorder %s107_s10, %s199_s0 }
   0x5   :  { %p113_p2 = pnand %p111_p1, %p108_p0 }
   0x7   :  { %116 = shalt.err (!%p113_p2)
}
   0x8   :  { %s117_s15 = scalar_lea.vmem %s14_s7, 128  ;;  %p122_p4 = scmp.lt.s32.totalorder %s14_s7, %s14_s7 }
   0x9   :  { %p118_p3 = scmp.ne.s32.totalorder %s14_s7, %s117_s15  ;;  %p123_p5 = scmp.lt.s32.totalorder %s117_s15, %s117_s15 }
   0xb   :  { %p124_p6 = por %p123_p5, %p122_p4 }
   0xd   :  { %p125_p7 = pnand %p124_p6, %p118_p3 }
   0xf   :  { %128 = shalt.err (!%p125_p7)
}
  0x10   :  { %s156_s16 = smov 64   ;;  %s157_s17 = smov 4  }
  0x11   :  { %19 = dma.hbm_to_vmem [thread:$0]  %s199_s0, 128, %s14_s7, [#allocation3], %s156_s16, %s156_s16, %s157_s17  }
  0x12   :  { %151 = dma.done.wait [#allocation3], 128  }
  0x13   :  { %152 = vsyncadd [#allocation3], 4294967168  ;;  %v23_v0 = vld [vmem:[#allocation2] sm:$0xf]  ;;  %vm27_vm0 = vcmask 1043456   ;;  %vm61_vm1 = vcmask 1041409  }
  0x14   :  { %v24_v1 = vld [vmem:[#allocation2 + $0x4] sm:$0xf]  ;;  %v25_v2 = vmul.f32 %v23_v0, %v23_v0  ;;  %vm64_vm2 = vcmask 1041408   ;;  %s158_s0 = smov [#allocation5]  }
  0x15   :  { %v26_v3 = vmul.f32 %v24_v1, %v24_v1  ;;  %s88_s20 = sshll.u32 %s158_s0, 4  ;;  %s89_s20 = int_to_ptr.vmem [resolvable:$true] %s88_s20 }
  0x16   :  { %v28_v4 = vsel %vm27_vm0, %v25_v2, 0.0  ;;  %s129_s21 = scalar_lea.vmem %s89_s20, 32  ;;  %p134_p9 = scmp.lt.s32.totalorder %s89_s20, %s89_s20 }
  0x17   :  { %29 = vadd.xlane.f32.xlu0 %v28_v4  ;;  %v31_v5 = vsel %vm27_vm0, %v26_v3, 0.0  ;;  %p130_p8 = scmp.ne.s32.totalorder %s89_s20, %s129_s21  ;;  %p135_p10 = scmp.lt.s32.totalorder %s129_s21, %s129_s21 }
  0x19   :  { %p136_p11 = por %p135_p10, %p134_p9 }
  0x1b   :  { %32 = vadd.xlane.f32.xlu0 %v31_v5  ;;  %p137_p12 = pnand %p136_p11, %p130_p8 }
  0xa4   :  { %v30_v6 = vpop.xlane.xlu0 %29 }
  0xa5   :  { %v34_v7 = vmax.f32 %v30_v6, 1e-24 }
  0xa7   :  { %101 = vrsqrt.f32 %v34_v7 }
  0xa8   :  { %v33_v8 = vpop.xlane.xlu0 %32 }
  0xa9   :  { %v35_v9 = vmax.f32 %v33_v8, 1e-24 }
  0xab   :  { %103 = vrsqrt.f32 %v35_v9 }
  0xb1   :  { %v102_v10 = vpop.eup %101 }
  0xb2   :  { %v38_v11 = vmul.f32 %v102_v10, %v23_v0 }
  0xb4   :  { %v40_v12 = vsel %vm27_vm0, %v38_v11, 0.0 }
  0xb5   :  { %v104_v13 = vpop.eup %103  ;;  %v41_v14 = vrot.slane %v40_v12, 4 }
  0xb6   :  { %v39_v15 = vmul.f32 %v104_v13, %v24_v1 }
  0xb7   :  { %v42_v16 = vadd.f32 %v41_v14, %v40_v12 }
  0xb8   :  { %v47_v17 = vsel %vm27_vm0, %v39_v15, 0.0 }
  0xb9   :  { %v43_v18 = vrot.slane %v42_v16, 2  ;;  %v48_v19 = vrot.slane %v47_v17, 4 }
  0xbb   :  { %v44_v20 = vadd.f32 %v43_v18, %v42_v16  ;;  %v49_v21 = vadd.f32 %v48_v19, %v47_v17 }
  0xbd   :  { %v45_v22 = vrot.slane %v44_v20, 1  ;;  %v50_v23 = vrot.slane %v49_v21, 2 }
  0xbf   :  { %v46_v24 = vadd.f32 %v45_v22, %v44_v20  ;;  %v51_v25 = vadd.f32 %v50_v23, %v49_v21 }
  0xc1   :  { %v52_v26 = vrot.slane %v51_v25, 1  ;;  %v55_v28 = vmul.f32 0.25, %v46_v24 }
  0xc3   :  { %v53_v27 = vadd.f32 %v52_v26, %v51_v25  ;;  %v57_v30 = vmul.f32 %v55_v28, %v55_v28 }
  0xc5   :  { %v56_v29 = vmul.f32 0.25, %v53_v27 }
  0xc7   :  { %v58_v31 = vmul.f32 %v56_v29, %v56_v29 }
  0xc9   :  { %v62_v32 = vsel %vm61_vm1, %v58_v31, %v57_v30 }
  0xca   :  { %v65_v33 = vsel %vm64_vm2, %v62_v32, 0.0 }
  0xcb   :  { %66 = vadd.xlane.f32.xlu1 %v65_v33 }
 0x158   :  { %v67_v34 = vpop.xlane.xlu1 %66 }
 0x159   :  { %v68_v35 = vmax.f32 %v67_v34, 1e-24 }
 0x15b   :  { %105 = vrsqrt.f32 %v68_v35 }
 0x165   :  { %v106_v36 = vpop.eup %105 }
 0x166   :  { %v71_v37 = vrot.slane %v106_v36, 1  ;;  %v74_v39 = vmul.f32 %v106_v36, %v55_v28 }
 0x168   :  { %v75_v38 = vmul.f32 %v71_v37, %v56_v29 }
 0x16a   :  { %v78_v40 = vrot.slane %v75_v38, 7 }
 0x16c   :  { %v79_v41 = vsel %vm61_vm1, %v78_v40, %v74_v39 }
 0x16d   :  { %81 = vst [vmem:[#allocation5] sm:$0x3] %v79_v41 }
 0x16e   :  { %140 = shalt.err (!%p137_p12)
}
 0x16f   :  { %s141_s24 = scalar_lea.hbm %s200_s1, 32 }
 0x170   :  { %p142_p13 = scmp.ne.s32.totalorder %s200_s1, %s141_s24  ;;  %p145_p0 = scmp.lt.u32.totalorder %s141_s24, %s200_s1 }
 0x172   :  { %p147_p1 = pnand %p145_p0, %p142_p13 }
 0x174   :  { %150 = shalt.err (!%p147_p1)
}
 0x175   :  { %91 = dma.vmem_to_hbm [thread:$0]  %s89_s20, 32, %s200_s1, [#allocation4]  }
 0x176   :  { %153 = dma.done.wait [#allocation4], 32  }
 0x177   :  { %154 = vsyncadd [#allocation4], 4294967264 }
 0x178   :  { %95 = vsyncpa [#allocation3], 1 }
 0x179   :  { %96 = vsyncpa [#allocation4], 1 }

</bundles_post_ra>
